<compile_context>
chip_gen: v7x
topology: tpu7x:2x2x1
jax: 0.10.0
libtpu: 0.0.40
codegen_flags: <defaults>
</compile_context>

<pallas_src>
import jax
import jax.numpy as jnp
import numpy as np
from jax.experimental import pallas as pl
from jax.experimental.pallas import tpu as pltpu


def _round_up(x, m):
    return ((x + m - 1) // m) * m


def critic_kernel(s_ref, a_ref, w1s_ref, w1a_ref, b1_ref,
                  w2_ref, b2_ref, w3_ref, b3_ref, o_ref):
    # bf16 cast in-kernel (near-free VPU pack) -> feeds the MXU.
    s = s_ref[...].astype(jnp.bfloat16)
    a = a_ref[...].astype(jnp.bfloat16)
    # Layer 1 (fused concat): h1 = relu(state @ W1_s + action @ W1_a + b1)
    h1 = jnp.dot(s, w1s_ref[...], preferred_element_type=jnp.float32)
    h1 = h1 + jnp.dot(a, w1a_ref[...], preferred_element_type=jnp.float32)
    h1 = jnp.maximum(h1 + b1_ref[...], 0.0)          # f32 elementwise (v5e-safe)
    # Layer 2: h2 = relu(h1 @ W2 + b2)   (bf16 MXU inputs, f32 accumulate)
    h2 = jnp.dot(h1.astype(w2_ref.dtype), w2_ref[...],
                 preferred_element_type=jnp.float32)
    h2 = jnp.maximum(h2 + b2_ref[...], 0.0)
    # Layer 3: out = h2 @ W3 + b3  (no activation); store in output dtype.
    out = jnp.dot(h2.astype(w3_ref.dtype), w3_ref[...],
                  preferred_element_type=jnp.float32)
    o_ref[...] = (out + b3_ref[...]).astype(o_ref.dtype)


def critic_forward(state, action, params, out_dim, *, batch_tile=1024,
                   out_dtype=jnp.bfloat16, return_padded=False):
    """Fused 3-layer critic MLP.

    Returns (B, out_dim) in `out_dtype`, or the full lane-padded (B, Op) block
    if `return_padded=True` (padded columns are exactly zero).
    """
    w1s, w1a, b1, w2, b2, w3, b3 = params
    B, Ds = state.shape
    Da = action.shape[1]
    H1p = w1s.shape[1]
    H2p = w2.shape[1]
    Op = w3.shape[1]

    # Batch tile: multiple of 8 (sublane); large default amortizes per-step
    # overhead.  Cap so the grid has >=2 steps when B allows it, keeping each
    # step's M a multiple of 256 (full MXU) -> both v7x TCs get work.
    TB = min(batch_tile, _round_up(B, 8))
    if B >= 512:
        TB = min(TB, _round_up(pl.cdiv(B, 2), 256))
    grid = (pl.cdiv(B, TB),)        # ragged last block: OOB rows clipped on store

    def batch_spec(d):
        return pl.BlockSpec((TB, d), lambda i: (i, 0))

    def resident(shape):
        # Constant index_map -> weights/biases stay VMEM-resident across the grid.
        return pl.BlockSpec(shape, lambda i: (0, 0))

    flops = 2 * B * (Ds * H1p + Da * H1p + H1p * H2p + H2p * Op)
    bytes_accessed = (
        (state.size + action.size) * 4                      # f32 activations in
        + (w1s.size + w1a.size + w2.size + w3.size) * 2     # bf16 weights
        + (b1.size + b2.size + b3.size) * 4                 # f32 biases
        + B * Op * jnp.dtype(out_dtype).itemsize            # output writeback
    )

    out = pl.pallas_call(
        critic_kernel,
        out_shape=jax.ShapeDtypeStruct((B, Op), out_dtype),
        grid=grid,
        in_specs=[
            batch_spec(Ds),            # state tile (f32)
            batch_spec(Da),            # action tile (f32)
            resident(w1s.shape),
            resident(w1a.shape),
            resident(b1.shape),
            resident(w2.shape),
            resident(b2.shape),
            resident(w3.shape),
            resident(b3.shape),
        ],
        out_specs=batch_spec(Op),
        compiler_params=pltpu.CompilerParams(
            dimension_semantics=("parallel",)),     # shards batch over v7x's 2 TCs
        cost_estimate=pl.CostEstimate(
            flops=flops, transcendentals=0, bytes_accessed=bytes_accessed),
    )(state, action, w1s, w1a, b1, w2, b2, w3, b3)

    if return_padded:
        return out                    # avoid a re-read of the padded buffer
    return out[:, :out_dim]


def init_critic_params(key, obs_size, action_size, hidden1=400, hidden2=300):
    """Init mimicking nn.Linear default uniform(-1/sqrt(fan_in), 1/sqrt(fan_in)).

    Weights stored as (in_features, out_features) = PyTorch W.T, zero-padded to
    lane-aligned feature widths (400->512, 300->384, out->128), cast to bf16.
    W1 is split into state/action halves so the kernel fuses the concat.
    Biases stay f32, shape (1, N_pad).  Padded regions are exactly zero, which
    keeps the padding mathematically inert through ReLU.
    """
    in_dim = obs_size + action_size
    H1p = _round_up(hidden1, 128)
    H2p = _round_up(hidden2, 128)
    Op = _round_up(action_size, 128)
    keys = jax.random.split(key, 6)

    def linear(kw, kb, fan_in, fan_out, fan_in_p, fan_out_p):
        lim = 1.0 / np.sqrt(fan_in)
        w = jax.random.uniform(kw, (fan_in, fan_out), jnp.float32, -lim, lim)
        b = jax.random.uniform(kb, (1, fan_out), jnp.float32, -lim, lim)
        w = jnp.pad(w, ((0, fan_in_p - fan_in), (0, fan_out_p - fan_out)))
        b = jnp.pad(b, ((0, 0), (0, fan_out_p - fan_out)))
        return w, b

    w1, b1 = linear(keys[0], keys[1], in_dim, hidden1, in_dim, H1p)
    w2, b2 = linear(keys[2], keys[3], hidden1, hidden2, H1p, H2p)
    w3, b3 = linear(keys[4], keys[5], hidden2, action_size, H2p, Op)

    w1s = w1[:obs_size].astype(jnp.bfloat16)   # (D_s, H1p)
    w1a = w1[obs_size:].astype(jnp.bfloat16)   # (D_a, H1p)
    return (w1s, w1a, b1,
            w2.astype(jnp.bfloat16), b2,
            w3.astype(jnp.bfloat16), b3)


def critic_reference(state, action, params, out_dim):
    """Pure-JAX reference using the same bf16 quantization as the kernel."""
    w1s, w1a, b1, w2, b2, w3, b3 = params
    s = state.astype(jnp.bfloat16)
    a = action.astype(jnp.bfloat16)
    h1 = (jnp.dot(s, w1s, preferred_element_type=jnp.float32)
          + jnp.dot(a, w1a, preferred_element_type=jnp.float32) + b1)
    h1 = jnp.maximum(h1, 0.0)
    h2 = jnp.maximum(
        jnp.dot(h1.astype(jnp.bfloat16), w2, preferred_element_type=jnp.float32) + b2,
        0.0)
    out = jnp.dot(h2.astype(jnp.bfloat16), w3,
                  preferred_element_type=jnp.float32) + b3
    return out[:, :out_dim]


if __name__ == "__main__":
    B, D_s, D_a = 8, 24, 4            # batch, state dim, action dim
    H1, H2 = 400, 300                 # hidden sizes from the module defaults

    key = jax.random.PRNGKey(0)
    k_state, k_action, k_params = jax.random.split(key, 3)

    state = jax.random.normal(k_state, (B, D_s), jnp.float32)
    action = jax.random.normal(k_action, (B, D_a), jnp.float32)
    params = init_critic_params(k_params, D_s, D_a, H1, H2)

    out = critic_forward(state, action, params, D_a)
    out = jax.block_until_ready(out)
    assert out.shape == (B, D_a)

    ref = critic_reference(state, action, params, D_a)
    np.testing.assert_allclose(np.asarray(out, dtype=np.float32),
                               np.asarray(ref, dtype=np.float32),
                               rtol=2e-2, atol=2e-2)

    print("KERNEL_OK")
</pallas_src>

<mosaic_0001>
module attributes {stable_mosaic.version = 11 : i64} {
  func.func @critic_kernel(%arg0: i32, %arg1: memref<8x24xf32, #tpu.memory_space<vmem>>, %arg2: memref<8x4xf32, #tpu.memory_space<vmem>>, %arg3: memref<24x512xbf16, #tpu.memory_space<vmem>>, %arg4: memref<4x512xbf16, #tpu.memory_space<vmem>>, %arg5: memref<1x512xf32, #tpu.memory_space<vmem>>, %arg6: memref<512x384xbf16, #tpu.memory_space<vmem>>, %arg7: memref<1x384xf32, #tpu.memory_space<vmem>>, %arg8: memref<384x128xbf16, #tpu.memory_space<vmem>>, %arg9: memref<1x128xf32, #tpu.memory_space<vmem>>, %arg10: memref<8x128xbf16, #tpu.memory_space<vmem>>) attributes {dimension_semantics = [#tpu.dimension_semantics<parallel>], iteration_bounds = array<i64: 1>, scalar_prefetch = 0 : i64, scratch_operands = 0 : i64, tpu.core_type = #tpu.core_type<tc>, window_params = [{transform_indices = @transform_0, window_bounds = array<i64: 8, 24>}, {transform_indices = @transform_1, window_bounds = array<i64: 8, 4>}, {pipeline_mode = #tpu.pipeline_mode<synchronous>, transform_indices = @transform_2, window_bounds = array<i64: 24, 512>}, {pipeline_mode = #tpu.pipeline_mode<synchronous>, transform_indices = @transform_3, window_bounds = array<i64: 4, 512>}, {pipeline_mode = #tpu.pipeline_mode<synchronous>, transform_indices = @transform_4, window_bounds = array<i64: 1, 512>}, {pipeline_mode = #tpu.pipeline_mode<synchronous>, transform_indices = @transform_5, window_bounds = array<i64: 512, 384>}, {pipeline_mode = #tpu.pipeline_mode<synchronous>, transform_indices = @transform_6, window_bounds = array<i64: 1, 384>}, {pipeline_mode = #tpu.pipeline_mode<synchronous>, transform_indices = @transform_7, window_bounds = array<i64: 384, 128>}, {pipeline_mode = #tpu.pipeline_mode<synchronous>, transform_indices = @transform_8, window_bounds = array<i64: 1, 128>}, {transform_indices = @transform_9, window_bounds = array<i64: 8, 128>}]} {
    %c0 = arith.constant 0 : index
    %c0_0 = arith.constant 0 : index
    %0 = vector.load %arg1[%c0, %c0_0] : memref<8x24xf32, #tpu.memory_space<vmem>>, vector<8x24xf32>
    %1 = arith.truncf %0 : vector<8x24xf32> to vector<8x24xbf16>
    %c0_1 = arith.constant 0 : index
    %c0_2 = arith.constant 0 : index
    %2 = vector.load %arg2[%c0_1, %c0_2] : memref<8x4xf32, #tpu.memory_space<vmem>>, vector<8x4xf32>
    %3 = arith.truncf %2 : vector<8x4xf32> to vector<8x4xbf16>
    %c0_3 = arith.constant 0 : index
    %c0_4 = arith.constant 0 : index
    %4 = vector.load %arg3[%c0_3, %c0_4] : memref<24x512xbf16, #tpu.memory_space<vmem>>, vector<24x512xbf16>
    %cst = arith.constant dense<0.000000e+00> : vector<8x512xf32>
    %5 = tpu.matmul %1, %4, %cst {dimension_numbers = #tpu.dot_dimension_numbers<[1], [0], [0], [1], [0, 0, 1, 1], [], []>} : vector<8x24xbf16>, vector<24x512xbf16>, vector<8x512xf32> -> vector<8x512xf32>
    %c0_5 = arith.constant 0 : index
    %c0_6 = arith.constant 0 : index
    %6 = vector.load %arg4[%c0_5, %c0_6] : memref<4x512xbf16, #tpu.memory_space<vmem>>, vector<4x512xbf16>
    %cst_7 = arith.constant dense<0.000000e+00> : vector<8x512xf32>
    %7 = tpu.matmul %3, %6, %cst_7 {dimension_numbers = #tpu.dot_dimension_numbers<[1], [0], [0], [1], [0, 0, 1, 1], [], []>} : vector<8x4xbf16>, vector<4x512xbf16>, vector<8x512xf32> -> vector<8x512xf32>
    %8 = arith.addf %5, %7 : vector<8x512xf32>
    %c0_8 = arith.constant 0 : index
    %c0_9 = arith.constant 0 : index
    %9 = vector.load %arg5[%c0_8, %c0_9] : memref<1x512xf32, #tpu.memory_space<vmem>>, vector<1x512xf32>
    %10 = vector.broadcast %9 : vector<1x512xf32> to vector<8x512xf32>
    %11 = arith.addf %8, %10 : vector<8x512xf32>
    %cst_10 = arith.constant 0.000000e+00 : f32
    %12 = vector.broadcast %cst_10 : f32 to vector<8x512xf32>
    %13 = arith.maximumf %11, %12 : vector<8x512xf32>
    %14 = arith.truncf %13 : vector<8x512xf32> to vector<8x512xbf16>
    %c0_11 = arith.constant 0 : index
    %c0_12 = arith.constant 0 : index
    %15 = vector.load %arg6[%c0_11, %c0_12] : memref<512x384xbf16, #tpu.memory_space<vmem>>, vector<512x384xbf16>
    %cst_13 = arith.constant dense<0.000000e+00> : vector<8x384xf32>
    %16 = tpu.matmul %14, %15, %cst_13 {dimension_numbers = #tpu.dot_dimension_numbers<[1], [0], [0], [1], [0, 0, 1, 1], [], []>} : vector<8x512xbf16>, vector<512x384xbf16>, vector<8x384xf32> -> vector<8x384xf32>
    %c0_14 = arith.constant 0 : index
    %c0_15 = arith.constant 0 : index
    %17 = vector.load %arg7[%c0_14, %c0_15] : memref<1x384xf32, #tpu.memory_space<vmem>>, vector<1x384xf32>
    %18 = vector.broadcast %17 : vector<1x384xf32> to vector<8x384xf32>
    %19 = arith.addf %16, %18 : vector<8x384xf32>
    %cst_16 = arith.constant 0.000000e+00 : f32
    %20 = vector.broadcast %cst_16 : f32 to vector<8x384xf32>
    %21 = arith.maximumf %19, %20 : vector<8x384xf32>
    %22 = arith.truncf %21 : vector<8x384xf32> to vector<8x384xbf16>
    %c0_17 = arith.constant 0 : index
    %c0_18 = arith.constant 0 : index
    %23 = vector.load %arg8[%c0_17, %c0_18] : memref<384x128xbf16, #tpu.memory_space<vmem>>, vector<384x128xbf16>
    %cst_19 = arith.constant dense<0.000000e+00> : vector<8x128xf32>
    %24 = tpu.matmul %22, %23, %cst_19 {dimension_numbers = #tpu.dot_dimension_numbers<[1], [0], [0], [1], [0, 0, 1, 1], [], []>} : vector<8x384xbf16>, vector<384x128xbf16>, vector<8x128xf32> -> vector<8x128xf32>
    %c0_20 = arith.constant 0 : index
    %c0_21 = arith.constant 0 : index
    %25 = vector.load %arg9[%c0_20, %c0_21] : memref<1x128xf32, #tpu.memory_space<vmem>>, vector<1x128xf32>
    %26 = vector.broadcast %25 : vector<1x128xf32> to vector<8x128xf32>
    %27 = arith.addf %24, %26 : vector<8x128xf32>
    %28 = arith.truncf %27 : vector<8x128xf32> to vector<8x128xbf16>
    %c0_22 = arith.constant 0 : index
    %c0_23 = arith.constant 0 : index
    %29 = vector.load %arg10[%c0_22, %c0_23] : memref<8x128xbf16, #tpu.memory_space<vmem>>, vector<8x128xbf16>
    tpu.vector_store %arg10[%c0_22, %c0_23], %28 {strides = array<i32>} : memref<8x128xbf16, #tpu.memory_space<vmem>>, vector<8x128xbf16>,
    return
  }
  func.func @transform_0(%arg0: i32) -> (i32, i32) {
    %c0_i32 = arith.constant 0 : i32
    %c0_i32_0 = arith.constant 0 : i32
    return %arg0, %c0_i32 : i32, i32
  }
  func.func @transform_1(%arg0: i32) -> (i32, i32) {
    %c0_i32 = arith.constant 0 : i32
    %c0_i32_0 = arith.constant 0 : i32
    return %arg0, %c0_i32 : i32, i32
  }
  func.func @transform_2(%arg0: i32) -> (i32, i32) {
    %c0_i32 = arith.constant 0 : i32
    %c0_i32_0 = arith.constant 0 : i32
    %c0_i32_1 = arith.constant 0 : i32
    return %c0_i32, %c0_i32_0 : i32, i32
  }
  func.func @transform_3(%arg0: i32) -> (i32, i32) {
    %c0_i32 = arith.constant 0 : i32
    %c0_i32_0 = arith.constant 0 : i32
    %c0_i32_1 = arith.constant 0 : i32
    return %c0_i32, %c0_i32_0 : i32, i32
  }
  func.func @transform_4(%arg0: i32) -> (i32, i32) {
    %c0_i32 = arith.constant 0 : i32
    %c0_i32_0 = arith.constant 0 : i32
    %c0_i32_1 = arith.constant 0 : i32
    return %c0_i32, %c0_i32_0 : i32, i32
  }
  func.func @transform_5(%arg0: i32) -> (i32, i32) {
    %c0_i32 = arith.constant 0 : i32
    %c0_i32_0 = arith.constant 0 : i32
    %c0_i32_1 = arith.constant 0 : i32
    return %c0_i32, %c0_i32_0 : i32, i32
  }
  func.func @transform_6(%arg0: i32) -> (i32, i32) {
    %c0_i32 = arith.constant 0 : i32
    %c0_i32_0 = arith.constant 0 : i32
    %c0_i32_1 = arith.constant 0 : i32
    return %c0_i32, %c0_i32_0 : i32, i32
  }
  func.func @transform_7(%arg0: i32) -> (i32, i32) {
    %c0_i32 = arith.constant 0 : i32
    %c0_i32_0 = arith.constant 0 : i32
    %c0_i32_1 = arith.constant 0 : i32
    return %c0_i32, %c0_i32_0 : i32, i32
  }
  func.func @transform_8(%arg0: i32) -> (i32, i32) {
    %c0_i32 = arith.constant 0 : i32
    %c0_i32_0 = arith.constant 0 : i32
    %c0_i32_1 = arith.constant 0 : i32
    return %c0_i32, %c0_i32_0 : i32, i32
  }
  func.func @transform_9(%arg0: i32) -> (i32, i32) {
    %c0_i32 = arith.constant 0 : i32
    %c0_i32_0 = arith.constant 0 : i32
    return %arg0, %c0_i32 : i32, i32
  }
}

</mosaic_0001>

<bundles_post_ra>
// kernel: tpu_custom_call.1
= control target key start
LH: loop header
LB: loop body
LE: loop exit
PB: predicated region body
PF: predicated region fallthrough
CT: control target
= control target key end

     0   :  { %14 = vsyncpa [#allocation3], 0  ;;  %s2165_s0 = inlined_call_operand.vmem [shape: f32[8,24], index: 0, kind: input, shape index: {}]   ;;  %s2166_s1 = inlined_call_operand.vmem [shape: f32[8,4], index: 1, kind: input, shape index: {}]   ;;  %s2167_s2 = inlined_call_operand.hbm [shape: bf16[24,512], index: 2, kind: input, shape index: {}]   ;;  %s2168_s3 = inlined_call_operand.vmem [shape: bf16[4,512], index: 3, kind: input, shape index: {}]   ;;  %s2169_s4 = inlined_call_operand.vmem [shape: f32[1,512], index: 4, kind: input, shape index: {}]   ;;  %s2170_s5 = inlined_call_operand.hbm [shape: bf16[512,384], index: 5, kind: input, shape index: {}]   ;;  %s2171_s6 = inlined_call_operand.vmem [shape: f32[1,384], index: 6, kind: input, shape index: {}]   ;;  %s2172_s7 = inlined_call_operand.hbm [shape: bf16[384,128], index: 7, kind: input, shape index: {}]   ;;  %s2173_s8 = inlined_call_operand.vmem [shape: f32[1,128], index: 8, kind: input, shape index: {}]   ;;  %s2174_s9 = inlined_call_operand.hbm [shape: bf16[8,128], index: 9, kind: output, shape index: {}]  }
   0x1   :  { %15 = vsyncpa [#allocation6], 0 }
   0x2   :  { %16 = vsyncpa [#allocation4], 0  ;;  %s1997_s30 = smov [#allocation5]   ;;  %s1903_s13 = scalar_lea.hbm %s2170_s5, 12288 }
   0x3   :  { %s42_s10 = sshll.u32 %s1997_s30, 4  ;;  %p1904_p0 = scmp.ne.s32.totalorder %s2170_s5, %s1903_s13  ;;  %s43_s10 = int_to_ptr.vmem [resolvable:$true] %s42_s10 }
   0x4   :  { %p1907_p1 = scmp.lt.u32.totalorder %s1903_s13, %s2170_s5 }
   0x6   :  { %p1909_p2 = pnand %p1907_p1, %p1904_p0 }
   0x8   :  { %1912 = shalt.err (!%p1909_p2)
}
   0x9   :  { %s1913_s18 = scalar_lea.vmem %s43_s10, 12288  ;;  %p1918_p4 = scmp.lt.s32.totalorder %s43_s10, %s43_s10 }
   0xa   :  { %p1914_p3 = scmp.ne.s32.totalorder %s43_s10, %s1913_s18  ;;  %p1919_p5 = scmp.lt.s32.totalorder %s1913_s18, %s1913_s18 }
   0xc   :  { %p1920_p6 = por %p1919_p5, %p1918_p4 }
   0xe   :  { %p1921_p7 = pnand %p1920_p6, %p1914_p3 }
  0x10   :  { %1924 = shalt.err (!%p1921_p7)
}
  0x11   :  { %s1998_s19 = smov 192   ;;  %s1999_s20 = smov 12  }
  0x12   :  { %48 = dma.hbm_to_vmem [thread:$0]  %s2170_s5, 12288, %s43_s10, [#allocation6], %s1998_s19, %s1998_s19, %s1999_s20  }
  0x13   :  { %s2000_s23 = smov [#allocation2]   ;;  %s1925_s27 = scalar_lea.hbm %s2167_s2, 768 }
  0x14   :  { %s26_s24 = sshll.u32 %s2000_s23, 4  ;;  %p1926_p8 = scmp.ne.s32.totalorder %s2167_s2, %s1925_s27  ;;  %s27_s24 = int_to_ptr.vmem [resolvable:$true] %s26_s24 }
  0x15   :  { %p1929_p9 = scmp.lt.u32.totalorder %s1925_s27, %s2167_s2 }
  0x17   :  { %p1931_p10 = pnand %p1929_p9, %p1926_p8 }
  0x19   :  { %1934 = shalt.err (!%p1931_p10)
}
  0x1a   :  { %s1935_s12 = scalar_lea.vmem %s27_s24, 768  ;;  %p1940_p12 = scmp.lt.s32.totalorder %s27_s24, %s27_s24 }
  0x1b   :  { %p1936_p11 = scmp.ne.s32.totalorder %s27_s24, %s1935_s12  ;;  %p1941_p13 = scmp.lt.s32.totalorder %s1935_s12, %s1935_s12 }
  0x1d   :  { %p1942_p0 = por %p1941_p13, %p1940_p12 }
  0x1f   :  { %p1943_p1 = pnand %p1942_p0, %p1936_p11 }
  0x21   :  { %1946 = shalt.err (!%p1943_p1)
}
  0x22   :  { %s2001_s5 = smov 256   ;;  %s2002_s10 = smov 16  }
  0x23   :  { %32 = dma.hbm_to_vmem [thread:$0]  %s2167_s2, 768, %s27_s24, [#allocation3], %s2001_s5, %s2001_s5, %s2002_s10  }
  0x24   :  { %s2003_s15 = smov [#allocation7]   ;;  %s1947_s19 = scalar_lea.hbm %s2172_s7, 3072 }
  0x25   :  { %s56_s16 = sshll.u32 %s2003_s15, 4  ;;  %p1948_p2 = scmp.ne.s32.totalorder %s2172_s7, %s1947_s19  ;;  %s57_s16 = int_to_ptr.vmem [resolvable:$true] %s56_s16 }
  0x26   :  { %p1951_p3 = scmp.lt.u32.totalorder %s1947_s19, %s2172_s7 }
  0x28   :  { %p1953_p4 = pnand %p1951_p3, %p1948_p2 }
  0x2a   :  { %1956 = shalt.err (!%p1953_p4)
}
  0x2b   :  { %s1957_s25 = scalar_lea.vmem %s57_s16, 3072  ;;  %p1962_p6 = scmp.lt.s32.totalorder %s57_s16, %s57_s16 }
  0x2c   :  { %p1958_p5 = scmp.ne.s32.totalorder %s57_s16, %s1957_s25  ;;  %p1963_p7 = scmp.lt.s32.totalorder %s1957_s25, %s1957_s25 }
  0x2e   :  { %p1964_p8 = por %p1963_p7, %p1962_p6 }
  0x30   :  { %p1965_p9 = pnand %p1964_p8, %p1958_p5 }
  0x32   :  { %1968 = shalt.err (!%p1965_p9)
}
  0x33   :  { %s2004_s2 = smov 64   ;;  %s2005_s24 = smov 4  }
  0x34   :  { %62 = dma.hbm_to_vmem [thread:$0]  %s2172_s7, 3072, %s57_s16, [#allocation6], %s2004_s2, %s2004_s2, %s2005_s24  }
  0x35   :  { %1991 = dma.done.wait [#allocation3], 768  }
  0x36   :  { %1992 = vsyncadd [#allocation3], 4294966528 }
  0x37   :  { %1993 = dma.done.wait [#allocation6], 15360  }
  0x38   :  { %1994 = vsyncadd [#allocation6], 4294951936  ;;  %v91_v0 = vlaneseq  ;;  %v2006_v1 = vmov 1983009808   ;;  %v2007_v3 = vmov 0   ;;  %v85_v7 = vld [vmem:[%s2168_s3] sm:$0xff] }
  0x39   :  { %v89_v2 = vunpack.c.l.s4 %v2006_v1  ;;  %153 = vmatprep.mubr.bf16.mxu0 %v2007_v3  ;;  %194 = vmatprep.mubr.bf16.mxu1 %v2007_v3  ;;  %vm108_vm0 = vcmask 1041408   ;;  %v87_v9 = vcombine.high %v85_v7, %v85_v7  ;;  %v77_v10 = vld [vmem:[%s2166_s1] sm:$0xff]  ;;  %vm104_vm1 = vcmask 31744   ;;  %v1748_v20 = vld [vmem:[#allocation2 + $0xc] ss:$16 sps:$4 sm:$0xff]   ;;  %s2010_s10 = smov [#allocation8]  }
  0x3a   :  { %v2097_v4 = vshrl.u32 %v91_v0, 7  ;;  %v1742_v13 = vld [vmem:[#allocation2 + $0x4] ss:$16 sps:$4 sm:$0xff]   ;;  %v78_v16 = vpack.c.bf16 %v77_v10, %v77_v10  ;;  %v1740_v17 = vld [vmem:[#allocation2] ss:$16 sps:$4 sm:$0xff]   ;;  %v84_v23 = vld [vmem:[#allocation2 + $0x28] sm:$0xff] }
  0x3b   :  { %v90_v5 = vunpack.c.0.s8 %v89_v2  ;;  %v83_v14 = vld [vmem:[#allocation2 + $0x20] sm:$0xff]  ;;  %vm237_vm2 = vcmask 1043456   ;;  %v1746_v24 = vld [vmem:[#allocation2 + $0x8] ss:$16 sps:$4 sm:$0xff]   ;;  %v1499_v26 = vcombine.high %v84_v23, %v84_v23  ;;  %v1498_v27 = vcombine.low %v84_v23, %v84_v23  ;;  %v1751_v32 = vld [vmem:[#allocation5] ss:$12 sps:$4 sm:$0xff]  }
  0x3c   :  { %v1497_v21 = vcombine.high %v83_v14, %v83_v14  ;;  %v1496_v22 = vcombine.low %v83_v14, %v83_v14  ;;  %v75_v25 = vld [vmem:[%s2165_s0] sm:$0xff]  ;;  %vm233_vm3 = vcmask 195584   ;;  %v1756_v33 = vld [vmem:[#allocation5 + $0x1c] ss:$12 sps:$4 sm:$0xff]   ;;  %v1754_v34 = vld [vmem:[#allocation5 + $0x18] ss:$12 sps:$4 sm:$0xff]  }
  0x3d   :  { %v93_v6 = vsub.s32 %v90_v5, %v2097_v4  ;;  %v1753_v29 = vld [vmem:[#allocation5 + $0x4] ss:$12 sps:$4 sm:$0xff]   ;;  %v76_v30 = vpack.c.bf16 %v75_v25, %v75_v25  ;;  %v245_v31 = vsel %vm237_vm2, %v1498_v27, 0  ;;  %v1778_v35 = vld [vmem:[#allocation5 + $0xc8] ss:$12 sps:$4 sm:$0xff]   ;;  %v340_v25 = vsub.s32 1, %v2097_v4 }
  0x3e   :  { %v239_v28 = vsel %vm237_vm2, %v1496_v22, 0  ;;  %v1779_v36 = vld [vmem:[#allocation5 + $0x8] ss:$12 sps:$4 sm:$0xff]   ;;  %v1783_v38 = vld [vmem:[#allocation5 + $0xe0] ss:$12 sps:$4 sm:$0xff]   ;;  %v336_v22 = vsub.s32 0, %v2097_v4 }
  0x3f   :  { %v94_v8 = vrot.slane %v85_v7, %v93_v6  ;;  %v101_v15 = vrot.slane %v87_v9, %v93_v6  ;;  %v1759_v37 = vld [vmem:[#allocation5 + $0x34] ss:$12 sps:$4 sm:$0xff]   ;;  %v1757_v40 = vld [vmem:[#allocation5 + $0x30] ss:$12 sps:$4 sm:$0xff]   ;;  %v1762_v41 = vld [vmem:[#allocation5 + $0x4c] ss:$12 sps:$4 sm:$0xff]  }
  0x40   :  { %v1784_v39 = vld [vmem:[#allocation5 + $0x20] ss:$12 sps:$4 sm:$0xff]   ;;  %v1788_v42 = vld [vmem:[#allocation5 + $0xf8] ss:$12 sps:$4 sm:$0xff]   ;;  %v1760_v43 = vld [vmem:[#allocation5 + $0x48] ss:$12 sps:$4 sm:$0xff]  }
  0x41   :  { %v102_v11 = vcombine.high %v94_v8, %v94_v8  ;;  %v110_v12 = vsel %vm108_vm0, %v94_v8, 0  ;;  %v103_v18 = vcombine.high %v101_v15, %v101_v15  ;;  %v116_v19 = vsel %vm108_vm0, %v101_v15, 0  ;;  %v1789_v44 = vld [vmem:[#allocation5 + $0x38] ss:$12 sps:$4 sm:$0xff]   ;;  %v1793_v46 = vld [vmem:[#allocation5 + $0x110] ss:$12 sps:$4 sm:$0xff]  }
  0x42   :  { %v1765_v45 = vld [vmem:[#allocation5 + $0x64] ss:$12 sps:$4 sm:$0xff]   ;;  %v1763_v47 = vld [vmem:[#allocation5 + $0x60] ss:$12 sps:$4 sm:$0xff]   ;;  %v1768_v49 = vld [vmem:[#allocation5 + $0x7c] ss:$12 sps:$4 sm:$0xff]  }
  0x43   :  { %1488 = vmatprep.subr.msk.bf16.mxu0 %vm108_vm0, %v102_v11  ;;  %1490 = vmatprep.subr.msk.bf16.mxu1 %vm108_vm0, %v103_v18  ;;  %v1794_v48 = vld [vmem:[#allocation5 + $0x50] ss:$12 sps:$4 sm:$0xff]   ;;  %v1766_v50 = vld [vmem:[#allocation5 + $0x78] ss:$12 sps:$4 sm:$0xff]   ;;  %v1771_v51 = vld [vmem:[#allocation5 + $0x94] ss:$12 sps:$4 sm:$0xff]  }
  0x44   :  { %122 = vmatpush1.bf16.msra.mxu0 %v110_v12  ;;  %163 = vmatpush1.bf16.msra.mxu1 %v116_v19  ;;  %v1769_v52 = vld [vmem:[#allocation5 + $0x90] ss:$12 sps:$4 sm:$0xff]   ;;  %v1774_v53 = vld [vmem:[#allocation5 + $0xac] ss:$12 sps:$4 sm:$0xff]   ;;  %v1772_v54 = vld [vmem:[#allocation5 + $0xa8] ss:$12 sps:$4 sm:$0xff]  }
  0x45   :  { %250 = vmatprep.subr.bf16.mxu0 %v1742_v13  ;;  %291 = vmatprep.subr.bf16.mxu1 %v1748_v20  ;;  %v1777_v55 = vld [vmem:[#allocation5 + $0xc4] ss:$12 sps:$4 sm:$0xff]   ;;  %v1775_v56 = vld [vmem:[#allocation5 + $0xc0] ss:$12 sps:$4 sm:$0xff]   ;;  %v1782_v57 = vld [vmem:[#allocation5 + $0xdc] ss:$12 sps:$4 sm:$0xff]  }
  0x46   :  { %v1780_v58 = vld [vmem:[#allocation5 + $0xd8] ss:$12 sps:$4 sm:$0xff]   ;;  %v1787_v59 = vld [vmem:[#allocation5 + $0xf4] ss:$12 sps:$4 sm:$0xff]   ;;  %v1785_v60 = vld [vmem:[#allocation5 + $0xf0] ss:$12 sps:$4 sm:$0xff]  }
  0x47   :  { %1489 = vmatmul.mubr.msk.bf16.vlgmr.msra.gmra.mrb[0].mxu0 %vm104_vm1, %v78_v16  ;;  %1491 = vmatmul.mubr.msk.bf16.vlgmr.msra.gmra.mrb[0].mxu1 %vm104_vm1, %v78_v16  ;;  %v1792_v61 = vld [vmem:[#allocation5 + $0x10c] ss:$12 sps:$4 sm:$0xff]   ;;  %v1790_v62 = vld [vmem:[#allocation5 + $0x108] ss:$12 sps:$4 sm:$0xff]   ;;  %v1797_v63 = vld [vmem:[#allocation5 + $0x124] ss:$12 sps:$4 sm:$0xff]  }
  0x48   :  { %251 = vmatpush1.bf16.msra.mxu0 %v1740_v17  ;;  %282 = vmatprep.mubr.bf16.mxu0 %v2007_v3  ;;  %v1798_v0 = vld [vmem:[#allocation5 + $0x128] ss:$12 sps:$4 sm:$0xff]   ;;  %v1795_v1 = vld [vmem:[#allocation5 + $0x120] ss:$12 sps:$4 sm:$0xff]   ;;  %v1805_v9 = vld [vmem:[#allocation5 + $0x150] ss:$12 sps:$4 sm:$0xff]  }
  0x49   :  { %1500 = vmatprep.subr.msk.bf16.mxu0 %vm237_vm2, %v1497_v21  ;;  %292 = vmatpush1.bf16.msra.mxu1 %v1746_v24  ;;  %v1799_v2 = vld [vmem:[#allocation5 + $0x68] ss:$12 sps:$4 sm:$0xff]   ;;  %v1803_v6 = vld [vmem:[#allocation5 + $0x140] ss:$12 sps:$4 sm:$0xff]   ;;  %v1808_v10 = vld [vmem:[#allocation5 + $0x158] ss:$12 sps:$4 sm:$0xff]  }
  0x4a   :  { %323 = vmatprep.mubr.bf16.mxu1 %v2007_v3  ;;  %1502 = vmatprep.subr.msk.bf16.mxu1 %vm237_vm2, %v1499_v26  ;;  %v1800_v3 = vld [vmem:[#allocation5 + $0x138] ss:$12 sps:$4 sm:$0xff]   ;;  %v1802_v5 = vld [vmem:[#allocation5 + $0x13c] ss:$12 sps:$4 sm:$0xff]   ;;  %v1804_v7 = vld [vmem:[#allocation5 + $0x80] ss:$12 sps:$4 sm:$0xff]  }
  0x4b   :  { %v1807_v8 = vld [vmem:[#allocation5 + $0x154] ss:$12 sps:$4 sm:$0xff]   ;;  %v1809_v11 = vld [vmem:[#allocation5 + $0x98] ss:$12 sps:$4 sm:$0xff]   ;;  %v1813_v13 = vld [vmem:[#allocation5 + $0x170] ss:$12 sps:$4 sm:$0xff]  }
  0x4c   :  { %253 = vmatpush1.bf16.msra.mxu0 %v239_v28  ;;  %v1812_v12 = vld [vmem:[#allocation5 + $0x16c] ss:$12 sps:$4 sm:$0xff]   ;;  %v1810_v14 = vld [vmem:[#allocation5 + $0x168] ss:$12 sps:$4 sm:$0xff]   ;;  %v1814_v15 = vld [vmem:[#allocation5 + $0xb0] ss:$12 sps:$4 sm:$0xff]  }
  0x4d   :  { %1023 = vmatprep.subr.bf16.mxu0 %v1753_v29  ;;  %294 = vmatpush1.bf16.msra.mxu1 %v245_v31  ;;  %v1817_v16 = vld [vmem:[#allocation5 + $0x184] ss:$12 sps:$4 sm:$0xff]   ;;  %v1818_v17 = vld [vmem:[#allocation5 + $0x248] ss:$12 sps:$4 sm:$0xff]   ;;  %vm2009_vm4 = vmmov 0   ;;  %s1478_s13 = sshll.u32 %s2010_s10, 4  ;;  %s1479_s13 = int_to_ptr.vmem [resolvable:$true] %s1478_s13 }
  0x4e   :  { %1625 = vmatprep.subr.bf16.mxu1 %v1778_v35  ;;  %v2123_v24 = vld [vmem:[%s2169_s4] sm:$0xf]  ;;  %s1969_s14 = scalar_lea.vmem %s1479_s13, 64  ;;  %p1974_p11 = scmp.lt.s32.totalorder %s1479_s13, %s1479_s13 }
  0x4f   :  { %1501 = vmatmul.mubr.msk.bf16.vlgmr.msra.gmra.mrb[4].mxu0 %vm233_vm3, %v76_v30  ;;  %v337_v29 = vrot.slane %v2123_v24, %v336_v22  ;;  %p1970_p10 = scmp.ne.s32.totalorder %s1479_s13, %s1969_s14  ;;  %p1975_p12 = scmp.lt.s32.totalorder %s1969_s14, %s1969_s14 }
  0x50   :  { %1024 = vmatpush1.bf16.msra.mxu0 %v1751_v32  ;;  %1503 = vmatmul.mubr.msk.bf16.vlgmr.msra.gmra.mrb[4].mxu1 %vm233_vm3, %v76_v30  ;;  %v348_v30 = vsub.s32 3, %v2097_v4  ;;  %v341_v32 = vrot.slane %v2123_v24, %v340_v25 }
  0x51   :  { %1025 = vmatprep.subr.bf16.mxu0 %v1756_v33  ;;  %1626 = vmatpush3.bf16.msra.mxu1 %v1779_v36  ;;  %p1976_p13 = por %p1975_p12, %p1974_p11 }
  0x52   :  { %1627 = vmatprep.subr.bf16.mxu1 %v1783_v38 }
  0x53   :  { %p1977_p0 = pnand %p1976_p13, %p1970_p10 }
  0x54   :  { %1026 = vmatpush1.bf16.msra.mxu0 %v1754_v34 }
  0x55   :  { %1027 = vmatprep.subr.bf16.mxu0 %v1759_v37  ;;  %1628 = vmatpush3.bf16.msra.mxu1 %v1784_v39 }
  0x56   :  { %1629 = vmatprep.subr.bf16.mxu1 %v1788_v42 }
  0x58   :  { %1028 = vmatpush1.bf16.msra.mxu0 %v1757_v40  ;;  %v349_v40 = vrot.slane %v2123_v24, %v348_v30  ;;  %v1860_v30 = vld [vmem:[#allocation5 + $0x25c] ss:$12 sps:$4 sm:$0xff]  }
  0x59   :  { %1029 = vmatprep.subr.bf16.mxu0 %v1762_v41  ;;  %1630 = vmatpush3.bf16.msra.mxu1 %v1789_v44 }
  0x5a   :  { %1631 = vmatprep.subr.bf16.mxu1 %v1793_v46 }
  0x5c   :  { %1030 = vmatpush1.bf16.msra.mxu0 %v1760_v43 }
  0x5d   :  { %1031 = vmatprep.subr.bf16.mxu0 %v1765_v45  ;;  %1632 = vmatpush3.bf16.msra.mxu1 %v1794_v48 }
  0x5e   :  { %1633 = vmatprep.subr.bf16.mxu1 %v1798_v0  ;;  %v1832_v0 = vld [vmem:[#allocation5 + $0x1cc] ss:$12 sps:$4 sm:$0xff]  }
  0x60   :  { %1032 = vmatpush1.bf16.msra.mxu0 %v1763_v47 }
  0x61   :  { %1033 = vmatprep.subr.bf16.mxu0 %v1768_v49  ;;  %1634 = vmatpush3.bf16.msra.mxu1 %v1799_v2  ;;  %v1830_v2 = vld [vmem:[#allocation5 + $0x1c8] ss:$12 sps:$4 sm:$0xff]  }
  0x62   :  { %1635 = vmatprep.subr.bf16.mxu1 %v1803_v6  ;;  %v1838_v6 = vld [vmem:[#allocation5 + $0x2a8] ss:$12 sps:$4 sm:$0xff]  }
  0x64   :  { %1034 = vmatpush1.bf16.msra.mxu0 %v1766_v50 }
  0x65   :  { %1035 = vmatprep.subr.bf16.mxu0 %v1771_v51  ;;  %1636 = vmatpush3.bf16.msra.mxu1 %v1804_v7  ;;  %v1815_v51 = vld [vmem:[#allocation5 + $0x180] ss:$12 sps:$4 sm:$0xff]   ;;  %v344_v7 = vsub.s32 2, %v2097_v4  ;;  %v1897_v4 = vld [vmem:[#allocation7 + $0x90] sm:$0xff]  }
  0x66   :  { %1637 = vmatprep.subr.bf16.mxu1 %v1808_v10  ;;  %v1842_v10 = vld [vmem:[#allocation5 + $0x1fc] ss:$12 sps:$4 sm:$0xff]  }
  0x68   :  { %1036 = vmatpush1.bf16.msra.mxu0 %v1769_v52  ;;  %v1819_v52 = vld [vmem:[#allocation5 + $0x188] ss:$12 sps:$4 sm:$0xff]  }
  0x69   :  { %1037 = vmatprep.subr.bf16.mxu0 %v1774_v53  ;;  %1638 = vmatpush3.bf16.msra.mxu1 %v1809_v11  ;;  %v1843_v11 = vld [vmem:[#allocation5 + $0x2c0] ss:$12 sps:$4 sm:$0xff]  }
  0x6a   :  { %1639 = vmatprep.subr.bf16.mxu1 %v1813_v13  ;;  %v1840_v13 = vld [vmem:[#allocation5 + $0x1f8] ss:$12 sps:$4 sm:$0xff]  }
  0x6c   :  { %1038 = vmatpush1.bf16.msra.mxu0 %v1772_v54  ;;  %v1822_v54 = vld [vmem:[#allocation5 + $0x19c] ss:$12 sps:$4 sm:$0xff]  }
  0x6d   :  { %1039 = vmatprep.subr.bf16.mxu0 %v1777_v55  ;;  %1640 = vmatpush3.bf16.msra.mxu1 %v1814_v15  ;;  %v1823_v55 = vld [vmem:[#allocation5 + $0x260] ss:$12 sps:$4 sm:$0xff]  }
  0x6e   :  { %1647 = vmatprep.subr.bf16.mxu1 %v1818_v17  ;;  %v1847_v15 = vld [vmem:[#allocation5 + $0x214] ss:$12 sps:$4 sm:$0xff]  }
  0x70   :  { %1040 = vmatpush1.bf16.msra.mxu0 %v1775_v56 }
  0x71   :  { %1041 = vmatprep.subr.bf16.mxu0 %v1782_v57 }
  0x74   :  { %1042 = vmatpush1.bf16.msra.mxu0 %v1780_v58  ;;  %v1820_v58 = vld [vmem:[#allocation5 + $0x198] ss:$12 sps:$4 sm:$0xff]  }
  0x75   :  { %1043 = vmatprep.subr.bf16.mxu0 %v1787_v59  ;;  %v1824_v59 = vld [vmem:[#allocation5 + $0x1a0] ss:$12 sps:$4 sm:$0xff]  }
  0x78   :  { %1044 = vmatpush1.bf16.msra.mxu0 %v1785_v60  ;;  %v1827_v60 = vld [vmem:[#allocation5 + $0x1b4] ss:$12 sps:$4 sm:$0xff]  }
  0x79   :  { %1045 = vmatprep.subr.bf16.mxu0 %v1792_v61  ;;  %v1828_v61 = vld [vmem:[#allocation5 + $0x278] ss:$12 sps:$4 sm:$0xff]  }
  0x7c   :  { %1046 = vmatpush1.bf16.msra.mxu0 %v1790_v62  ;;  %v1825_v62 = vld [vmem:[#allocation5 + $0x1b0] ss:$12 sps:$4 sm:$0xff]  }
  0x7d   :  { %1047 = vmatprep.subr.bf16.mxu0 %v1797_v63  ;;  %v1829_v63 = vld [vmem:[#allocation5 + $0x1b8] ss:$12 sps:$4 sm:$0xff]  }
  0x80   :  { %1048 = vmatpush1.bf16.msra.mxu0 %v1795_v1  ;;  %v1833_v1 = vld [vmem:[#allocation5 + $0x290] ss:$12 sps:$4 sm:$0xff]  }
  0x81   :  { %1049 = vmatprep.subr.bf16.mxu0 %v1802_v5  ;;  %v1837_v5 = vld [vmem:[#allocation5 + $0x1e4] ss:$12 sps:$4 sm:$0xff]  }
  0x84   :  { %1050 = vmatpush1.bf16.msra.mxu0 %v1800_v3  ;;  %v1834_v3 = vld [vmem:[#allocation5 + $0x1d0] ss:$12 sps:$4 sm:$0xff]  }
  0x85   :  { %1051 = vmatprep.subr.bf16.mxu0 %v1807_v8  ;;  %v1835_v8 = vld [vmem:[#allocation5 + $0x1e0] ss:$12 sps:$4 sm:$0xff]  }
  0x88   :  { %1052 = vmatpush1.bf16.msra.mxu0 %v1805_v9  ;;  %v1839_v9 = vld [vmem:[#allocation5 + $0x1e8] ss:$12 sps:$4 sm:$0xff]  }
  0x89   :  { %1053 = vmatprep.subr.bf16.mxu0 %v1812_v12  ;;  %v345_v12 = vrot.slane %v2123_v24, %v344_v7  ;;  %v1850_v24 = vld [vmem:[#allocation5 + $0x228] ss:$12 sps:$4 sm:$0xff]  }
  0x8c   :  { %1054 = vmatpush1.bf16.msra.mxu0 %v1810_v14  ;;  %v1844_v14 = vld [vmem:[#allocation5 + $0x200] ss:$12 sps:$4 sm:$0xff]  }
  0x8d   :  { %1064 = vmatprep.subr.bf16.mxu0 %v1817_v16  ;;  %v1848_v16 = vld [vmem:[#allocation5 + $0x2d8] ss:$12 sps:$4 sm:$0xff]  }
 0x11a   :  { %v155_v18 = vpop.f32.mrb[0].mxu0  ;;  %v196_v23 = vpop.f32.mrb[0].mxu1 }
 0x11b   :  { %v157_v19 = vpop.f32.mrb[1].mxu0  ;;  %v198_v26 = vpop.f32.mrb[1].mxu1 }
 0x11c   :  { %v159_v20 = vpop.f32.mrb[2].mxu0  ;;  %v200_v27 = vpop.f32.mrb[2].mxu1 }
 0x11d   :  { %v160_v21 = vpop.f32.mrb[3].mxu0  ;;  %v201_v28 = vpop.f32.mrb[3].mxu1  ;;  %v1852_v20 = vld [vmem:[#allocation5 + $0x22c] ss:$12 sps:$4 sm:$0xff]   ;;  %v1857_v27 = vld [vmem:[#allocation5 + $0x244] ss:$12 sps:$4 sm:$0xff]  }
 0x11e   :  { %v1853_v21 = vld [vmem:[#allocation5 + $0x2f0] ss:$12 sps:$4 sm:$0xff]  }
 0x122   :  { %v284_v31 = vpop.f32.mrb[4].mxu0 }
 0x123   :  { %v285_v33 = vadd.f32 %v284_v31, %v155_v18  ;;  %v286_v34 = vpop.f32.mrb[5].mxu0  ;;  %v325_v39 = vpop.f32.mrb[4].mxu1  ;;  %v1845_v18 = vld [vmem:[#allocation5 + $0x210] ss:$12 sps:$4 sm:$0xff]   ;;  %v1858_v31 = vld [vmem:[#allocation5 + $0x258] ss:$12 sps:$4 sm:$0xff]  }
 0x124   :  { %v287_v35 = vadd.f32 %v286_v34, %v157_v19  ;;  %v288_v36 = vpop.f32.mrb[6].mxu0  ;;  %v2134_v42 = vadd.f32 %v325_v39, %v196_v23  ;;  %v327_v43 = vpop.f32.mrb[5].mxu1  ;;  %v1849_v19 = vld [vmem:[#allocation5 + $0x218] ss:$12 sps:$4 sm:$0xff]  }
 0x125   :  { %v354_v37 = vadd.f32 %v337_v29, %v285_v33  ;;  %v289_v38 = vpop.f32.mrb[7].mxu0  ;;  %v328_v45 = vadd.f32 %v327_v43, %v198_v26  ;;  %v329_v46 = vpop.f32.mrb[6].mxu1  ;;  %v1854_v26 = vld [vmem:[#allocation5 + $0x230] ss:$12 sps:$4 sm:$0xff]   ;;  %v1855_v29 = vld [vmem:[#allocation5 + $0x240] ss:$12 sps:$4 sm:$0xff]  }
 0x126   :  { %v355_v41 = vadd.f32 %v341_v32, %v287_v35  ;;  %v330_v48 = vpop.f32.mrb[7].mxu1  ;;  %v356_v17 = vadd.f32 %v345_v12, %v2134_v42  ;;  %v1863_v32 = vld [vmem:[#allocation5 + $0x274] ss:$12 sps:$4 sm:$0xff]   ;;  %v1861_v33 = vld [vmem:[#allocation5 + $0x270] ss:$12 sps:$4 sm:$0xff]   ;;  %v1881_v46 = vld [vmem:[#allocation7 + $0x48] sm:$0xff]  }
 0x127   :  { %v358_v44 = vmax.f32 %v354_v37, 0.0  ;;  %v357_v49 = vadd.f32 %v349_v40, %v328_v45  ;;  %v1866_v34 = vld [vmem:[#allocation5 + $0x28c] ss:$12 sps:$4 sm:$0xff]   ;;  %v1864_v35 = vld [vmem:[#allocation5 + $0x288] ss:$12 sps:$4 sm:$0xff]   ;;  %v1880_v45 = vld [vmem:[#allocation7] sm:$0xff]  }
 0x128   :  { %v359_v47 = vmax.f32 %v355_v41, 0.0  ;;  %v360_v23 = vmax.f32 %v356_v17, 0.0  ;;  %v1869_v36 = vld [vmem:[#allocation5 + $0x2a4] ss:$12 sps:$4 sm:$0xff]   ;;  %v1867_v37 = vld [vmem:[#allocation5 + $0x2a0] ss:$12 sps:$4 sm:$0xff]  }
 0x129   :  { %v362_v53 = vpack.c.bf16 %v358_v44, %v358_v44  ;;  %v361_v56 = vmax.f32 %v357_v49, 0.0  ;;  %v1872_v38 = vld [vmem:[#allocation5 + $0x2bc] ss:$12 sps:$4 sm:$0xff]   ;;  %v1870_v39 = vld [vmem:[#allocation5 + $0x2b8] ss:$12 sps:$4 sm:$0xff]   ;;  %v1883_v48 = vld [vmem:[#allocation7 + $0x50] sm:$0xff]  }
 0x12a   :  { %v363_v50 = vpack.c.bf16 %v359_v47, %v359_v47  ;;  %v364_v28 = vpack.c.bf16 %v360_v23, %v360_v23  ;;  %v1875_v40 = vld [vmem:[#allocation5 + $0x2d4] ss:$12 sps:$4 sm:$0xff]   ;;  %v1873_v41 = vld [vmem:[#allocation5 + $0x2d0] ss:$12 sps:$4 sm:$0xff]   ;;  %v1878_v42 = vld [vmem:[#allocation5 + $0x2ec] ss:$12 sps:$4 sm:$0xff]  }
 0x12b   :  { %v365_v57 = vpack.c.bf16 %v361_v56, %v361_v56  ;;  %v1876_v43 = vld [vmem:[#allocation5 + $0x2e8] ss:$12 sps:$4 sm:$0xff]   ;;  %v1879_v44 = vld [vmem:[#allocation7 + $0x40] sm:$0xff]  }
 0x12c   :  { %1055 = vmatprep.mubr.bf16.mxu0 %v363_v50  ;;  %1137 = vmatprep.mubr.bf16.mxu1 %v363_v50  ;;  %v1882_v47 = vld [vmem:[#allocation7 + $0x8] sm:$0xff]   ;;  %v1884_v49 = vld [vmem:[#allocation7 + $0x10] sm:$0xff]   ;;  %v1885_v50 = vld [vmem:[#allocation7 + $0x58] sm:$0xff]  }
 0x12d   :  { %1056 = vmatmul.mubr.bf16.vlgmr.msra.gmra.mrb[8].mxu0 %v362_v53  ;;  %1138 = vmatmul.mubr.bf16.vlgmr.msra.gmra.mrb[8].mxu1 %v362_v53  ;;  %v1888_v53 = vld [vmem:[#allocation7 + $0x20] sm:$0xff]   ;;  %v1891_v56 = vld [vmem:[#allocation7 + $0x70] sm:$0xff]  }
 0x12e   :  { %1065 = vmatpush1.bf16.msra.mxu0 %v1815_v51  ;;  %1648 = vmatpush3.bf16.msra.mxu1 %v1819_v52  ;;  %v1886_v51 = vld [vmem:[#allocation7 + $0x18] sm:$0xff]   ;;  %v1887_v52 = vld [vmem:[#allocation7 + $0x60] sm:$0xff]  }
 0x12f   :  { %1066 = vmatprep.subr.bf16.mxu0 %v1822_v54  ;;  %1649 = vmatprep.subr.bf16.mxu1 %v1823_v55  ;;  %v1889_v54 = vld [vmem:[#allocation7 + $0x68] sm:$0xff]  }
 0x130   :  { %1177 = vmatprep.mubr.bf16.mxu1 %v365_v57  ;;  %1096 = vmatprep.mubr.bf16.mxu0 %v365_v57  ;;  %v1890_v55 = vld [vmem:[#allocation7 + $0x28] sm:$0xff]   ;;  %v1892_v57 = vld [vmem:[#allocation7 + $0x30] sm:$0xff]  }
 0x132   :  { %1067 = vmatpush1.bf16.msra.mxu0 %v1820_v58  ;;  %1650 = vmatpush3.bf16.msra.mxu1 %v1824_v59  ;;  %v1893_v58 = vld [vmem:[#allocation7 + $0x78] sm:$0xff]  }
 0x133   :  { %1068 = vmatprep.subr.bf16.mxu0 %v1827_v60  ;;  %1651 = vmatprep.subr.bf16.mxu1 %v1828_v61  ;;  %v1894_v59 = vld [vmem:[#allocation7 + $0x38] sm:$0xff]   ;;  %v2008_v60 = vmov 0.0  }
 0x136   :  { %1069 = vmatpush1.bf16.msra.mxu0 %v1825_v62  ;;  %1652 = vmatpush3.bf16.msra.mxu1 %v1829_v63 }
 0x137   :  { %1070 = vmatprep.subr.bf16.mxu0 %v1832_v0  ;;  %1653 = vmatprep.subr.bf16.mxu1 %v1833_v1 }
 0x13a   :  { %1071 = vmatpush1.bf16.msra.mxu0 %v1830_v2  ;;  %1654 = vmatpush3.bf16.msra.mxu1 %v1834_v3  ;;  %v494_v2 = vld [vmem:[%s2171_s6] sm:$0x7] }
 0x13b   :  { %1072 = vmatprep.subr.bf16.mxu0 %v1837_v5  ;;  %1655 = vmatprep.subr.bf16.mxu1 %v1838_v6  ;;  %v507_v3 = vrot.slane %v494_v2, %v344_v7 }
 0x13e   :  { %1073 = vmatpush1.bf16.msra.mxu0 %v1835_v8  ;;  %1656 = vmatpush3.bf16.msra.mxu1 %v1839_v9 }
 0x13f   :  { %1074 = vmatprep.subr.bf16.mxu0 %v1842_v10  ;;  %1657 = vmatprep.subr.bf16.mxu1 %v1843_v11 }
 0x142   :  { %1075 = vmatpush1.bf16.msra.mxu0 %v1840_v13  ;;  %1658 = vmatpush3.bf16.msra.mxu1 %v1844_v14  ;;  %v499_v13 = vrot.slane %v494_v2, %v336_v22  ;;  %v503_v14 = vrot.slane %v494_v2, %v340_v25  ;;  %v1898_v22 = vld [vmem:[#allocation7 + $0x98] sm:$0xff]   ;;  %v1899_v25 = vld [vmem:[#allocation7 + $0xa0] sm:$0xff]  }
 0x143   :  { %1076 = vmatprep.subr.bf16.mxu0 %v1847_v15  ;;  %1659 = vmatprep.subr.bf16.mxu1 %v1848_v16 }
 0x146   :  { %1077 = vmatpush1.bf16.msra.mxu0 %v1845_v18  ;;  %1660 = vmatpush3.bf16.msra.mxu1 %v1849_v19 }
 0x147   :  { %1078 = vmatprep.subr.bf16.mxu0 %v1852_v20  ;;  %1661 = vmatprep.subr.bf16.mxu1 %v1853_v21 }
 0x14a   :  { %1079 = vmatpush1.bf16.msra.mxu0 %v1850_v24  ;;  %1662 = vmatpush3.bf16.msra.mxu1 %v1854_v26  ;;  %v1895_v24 = vld [vmem:[#allocation7 + $0x80] sm:$0xff]  }
 0x14b   :  { %1080 = vmatprep.subr.bf16.mxu0 %v1857_v27  ;;  %1669 = vmatprep.subr.bf16.mxu1 %v1879_v44  ;;  %v1896_v27 = vld [vmem:[#allocation7 + $0x88] sm:$0xff]  }
 0x14d   :  { %1178 = vmatmul.mubr.bf16.vlgmr.msra.gmra.mrb[12].mxu1 %v364_v28 }
 0x14e   :  { %1081 = vmatpush1.bf16.msra.mxu0 %v1855_v29  ;;  %1670 = vmatpush3.bf16.msra.mxu1 %v1880_v45  ;;  %v1901_v29 = vld [vmem:[#allocation7 + $0xb0] sm:$0xff]  }
 0x14f   :  { %1082 = vmatprep.subr.bf16.mxu0 %v1860_v30  ;;  %1671 = vmatprep.subr.bf16.mxu1 %v1881_v46  ;;  %v1902_v30 = vld [vmem:[#allocation7 + $0xb8] sm:$0xff]  }
 0x152   :  { %1083 = vmatpush1.bf16.msra.mxu0 %v1858_v31  ;;  %1672 = vmatpush3.bf16.msra.mxu1 %v1882_v47 }
 0x153   :  { %1084 = vmatprep.subr.bf16.mxu0 %v1863_v32  ;;  %1673 = vmatprep.subr.bf16.mxu1 %v1883_v48 }
 0x156   :  { %1085 = vmatpush1.bf16.msra.mxu0 %v1861_v33  ;;  %1674 = vmatpush3.bf16.msra.mxu1 %v1884_v49 }
 0x157   :  { %1086 = vmatprep.subr.bf16.mxu0 %v1866_v34  ;;  %1675 = vmatprep.subr.bf16.mxu1 %v1885_v50 }
 0x15a   :  { %1087 = vmatpush1.bf16.msra.mxu0 %v1864_v35  ;;  %1676 = vmatpush3.bf16.msra.mxu1 %v1886_v51 }
 0x15b   :  { %1088 = vmatprep.subr.bf16.mxu0 %v1869_v36  ;;  %1677 = vmatprep.subr.bf16.mxu1 %v1887_v52 }
 0x15e   :  { %1089 = vmatpush1.bf16.msra.mxu0 %v1867_v37  ;;  %1678 = vmatpush3.bf16.msra.mxu1 %v1888_v53 }
 0x15f   :  { %1090 = vmatprep.subr.bf16.mxu0 %v1872_v38  ;;  %1679 = vmatprep.subr.bf16.mxu1 %v1889_v54  ;;  %v1600_v38 = vld [vmem:[%s2173_s8] ss:$0 sm:$0xff] }
 0x162   :  { %1091 = vmatpush1.bf16.msra.mxu0 %v1870_v39  ;;  %1680 = vmatpush3.bf16.msra.mxu1 %v1890_v55 }
 0x163   :  { %1092 = vmatprep.subr.bf16.mxu0 %v1875_v40  ;;  %1681 = vmatprep.subr.bf16.mxu1 %v1891_v56 }
 0x166   :  { %1093 = vmatpush1.bf16.msra.mxu0 %v1873_v41  ;;  %1682 = vmatpush3.bf16.msra.mxu1 %v1892_v57 }
 0x167   :  { %1094 = vmatprep.subr.bf16.mxu0 %v1878_v42  ;;  %1683 = vmatprep.subr.bf16.mxu1 %v1893_v58 }
 0x16a   :  { %1095 = vmatpush1.bf16.msra.mxu0 %v1876_v43  ;;  %1684 = vmatpush3.bf16.msra.mxu1 %v1894_v59 }
 0x16b   :  { %1700 = vmatprep.subr.bf16.mxu1 %v2008_v60 }
 0x16d   :  { %1097 = vmatmul.mubr.bf16.vlgmr.msra.gmra.mrb[8].mxu0 %v364_v28  ;;  %v1900_v28 = vld [vmem:[#allocation7 + $0xa8] sm:$0xff]  }
 0x200   :  { %v1641_v61 = vpop.f32.mrb[8].mxu1 }
 0x201   :  { %v1642_v62 = vpop.f32.mrb[9].mxu1 }
 0x202   :  { %v1643_v63 = vadd.f32 %v1642_v62, %v1641_v61  ;;  %v1644_v0 = vpop.f32.mrb[10].mxu1 }
 0x203   :  { %v1645_v1 = vpop.f32.mrb[11].mxu1 }
 0x204   :  { %v1140_v8 = vadd.f32 %v1643_v63, %v507_v3 }
 0x220   :  { %v1663_v5 = vpop.f32.mrb[12].mxu1 }
 0x221   :  { %v1664_v6 = vpop.f32.mrb[13].mxu1 }
 0x222   :  { %v1665_v9 = vadd.f32 %v1664_v6, %v1663_v5  ;;  %v1666_v10 = vpop.f32.mrb[14].mxu1 }
 0x223   :  { %v1667_v11 = vpop.f32.mrb[15].mxu1 }
 0x224   :  { %v1180_v12 = vadd.f32 %v1665_v9, %v1140_v8 }
 0x226   :  { %v1187_v31 = vmax.f32 %v1180_v12, 0.0 }
 0x228   :  { %v1190_v32 = vpack.c.bf16 %v1187_v31, %v1187_v31 }
 0x240   :  { %v1098_v15 = vpop.f32.mrb[8].mxu0 }
 0x241   :  { %v1720_v16 = vadd.f32 %v1098_v15, %v499_v13  ;;  %v1100_v17 = vpop.f32.mrb[9].mxu0 }
 0x242   :  { %v1721_v18 = vadd.f32 %v1100_v17, %v503_v14  ;;  %v1102_v19 = vpop.f32.mrb[10].mxu0 }
 0x243   :  { %v1185_v20 = vmax.f32 %v1720_v16, 0.0  ;;  %v1103_v7 = vpop.f32.mrb[11].mxu0 }
 0x244   :  { %v1186_v21 = vmax.f32 %v1721_v18, 0.0 }
 0x245   :  { %v1188_v26 = vpack.c.bf16 %v1185_v20, %v1185_v20 }
 0x246   :  { %v1189_v23 = vpack.c.bf16 %v1186_v21, %v1186_v21 }
 0x248   :  { %1422 = vmatprep.mubr.bf16.mxu1 %v1189_v23 }
 0x249   :  { %1423 = vmatmul.mubr.bf16.vlgmr.msra.gmra.mrb[16].mxu1 %v1188_v26 }
 0x24a   :  { %1701 = vmatpush3.bf16.msra.mxu1 %v1895_v24  ;;  %1716 = vmatprep.mubr.msk.bf16.mxu1 %vm2009_vm4, %v2008_v60 }
 0x24b   :  { %1702 = vmatprep.subr.bf16.mxu1 %v2008_v60 }
 0x24e   :  { %1703 = vmatpush3.bf16.msra.mxu1 %v1896_v27 }
 0x24f   :  { %1704 = vmatprep.subr.bf16.mxu1 %v2008_v60 }
 0x252   :  { %1705 = vmatpush3.bf16.msra.mxu1 %v1897_v4 }
 0x253   :  { %1706 = vmatprep.subr.bf16.mxu1 %v2008_v60 }
 0x256   :  { %1707 = vmatpush3.bf16.msra.mxu1 %v1898_v22 }
 0x257   :  { %1708 = vmatprep.subr.bf16.mxu1 %v2008_v60 }
 0x25a   :  { %1709 = vmatpush3.bf16.msra.mxu1 %v1899_v25 }
 0x25b   :  { %1710 = vmatprep.subr.bf16.mxu1 %v2008_v60 }
 0x25e   :  { %1711 = vmatpush3.bf16.msra.mxu1 %v1900_v28 }
 0x25f   :  { %1712 = vmatprep.subr.bf16.mxu1 %v2008_v60 }
 0x262   :  { %1713 = vmatpush3.bf16.msra.mxu1 %v1901_v29 }
 0x263   :  { %1714 = vmatprep.subr.bf16.mxu1 %v2008_v60 }
 0x266   :  { %1715 = vmatpush3.bf16.msra.mxu1 %v1902_v30 }
 0x269   :  { %1717 = vmatmul.mubr.bf16.vlgmr.msra.gmra.mrb[20].mxu1 %v1190_v32 }
 0x31c   :  { %v1685_v33 = vpop.f32.mrb[16].mxu1 }
 0x31d   :  { %v1686_v34 = vpop.f32.mrb[17].mxu1 }
 0x31e   :  { %v1687_v35 = vadd.f32 %v1686_v34, %v1685_v33  ;;  %v1688_v36 = vpop.f32.mrb[18].mxu1 }
 0x31f   :  { %v1689_v37 = vpop.f32.mrb[19].mxu1 }
 0x320   :  { %v1425_v39 = vadd.f32 %v1687_v35, %v1600_v38 }
 0x33c   :  { %v1464_v40 = vpop.f32.mrb[20].mxu1 }
 0x33d   :  { %v1465_v41 = vadd.f32 %v1464_v40, %v1425_v39  ;;  %v1718_v42 = vpop.f32.mrb[21].mxu1 }
 0x33e   :  { %v1467_v43 = vpop.f32.mrb[22].mxu1 }
 0x33f   :  { %v1470_v44 = vpack.c.bf16 %v1465_v41, %v1465_v41  ;;  %v1719_v45 = vpop.f32.mrb[23].mxu1 }
 0x341   :  { %1471 = vst [vmem:[#allocation8] sm:$0xf] %v1470_v44 }
 0x342   :  { %1980 = shalt.err (!%p1977_p0)
}
 0x343   :  { %s1981_s16 = scalar_lea.hbm %s2174_s9, 64 }
 0x344   :  { %p1982_p1 = scmp.ne.s32.totalorder %s2174_s9, %s1981_s16  ;;  %p1985_p2 = scmp.lt.u32.totalorder %s1981_s16, %s2174_s9 }
 0x346   :  { %p1987_p3 = pnand %p1985_p2, %p1982_p1 }
 0x348   :  { %1990 = shalt.err (!%p1987_p3)
}
 0x349   :  { %1481 = dma.vmem_to_hbm [thread:$0]  %s1479_s13, 64, %s2174_s9, [#allocation4]  }
 0x34a   :  { %1995 = dma.done.wait [#allocation4], 64  }
 0x34b   :  { %1996 = vsyncadd [#allocation4], 4294967232 }
 0x34c   :  { %1485 = vsyncpa [#allocation3], 1 }
 0x34d   :  { %1486 = vsyncpa [#allocation6], 1 }
 0x34e   :  { %1487 = vsyncpa [#allocation4], 1 }

</bundles_post_ra>
